<compile_context>
chip_gen: v6e
topology: v6e:2x2x1
jax: 0.10.0
libtpu: 0.0.40
codegen_flags: <defaults>
</compile_context>

<pallas_src>
import jax
import jax.numpy as jnp
from jax.experimental import pallas as pl
from jax.experimental.pallas import tpu as pltpu

_MIB = 1024 * 1024


def _vmem_capacity_bytes() -> int:
    """Per-core physical VMEM; falls back to the smallest across generations
    (v7x: 64 MiB per TensorCore) if the query is unavailable."""
    default = 64 * _MIB
    try:
        info = pltpu.get_tpu_info()
        return int(getattr(info, "vmem_capacity_bytes", default))
    except Exception:
        return default


def _choose_block_rows(batch: int, num_classes: int, in_itemsize: int,
                       vmem_capacity: int, align: int) -> int:
    """Batch-tile rows sized from the real VMEM footprint: double-buffered
    input tile + ~4 live f32/(int32) (rows, C) intermediates."""
    bytes_per_row = (2 * num_classes * in_itemsize   # double-buffered DMA tile
                     + 4 * num_classes * 4           # live f32/int32 temps
                     + 64)                           # labels + per-row vectors
    budget = max(2 * _MIB, vmem_capacity // 3)
    rows = int(budget // max(1, bytes_per_row))
    rows = max(align, min(rows, 1 << 16))            # no tiny 2048-row cap
    rows = (rows // align) * align
    if rows >= batch:
        return batch
    return max(align, rows)


def _make_row_major_kernel(batch, num_inlier, lambda_coarse,
                           tiles_per_core, block_rows):
    """Layout (rows, classes): used when C >= 128 (classes already lane-dense)."""
    inv_b = 1.0 / float(batch)

    def kernel(logits_ref, labels_ref, out_ref, acc_ref):
        core = pl.program_id(0)
        step = pl.program_id(1)

        @pl.when(step == 0)
        def _init():
            acc_ref[...] = jnp.zeros_like(acc_ref)

        logits = logits_ref[...].astype(jnp.float32)        # (TB, C)
        labels = labels_ref[...]                            # (TB, 1) int32
        tb, c = logits.shape

        class_ids = jax.lax.broadcasted_iota(jnp.int32, (tb, c), 1)

        row_max = jnp.max(logits, axis=1, keepdims=True)     # (TB, 1)
        exps = jnp.exp(logits - row_max)                     # (TB, C)
        denom = jnp.sum(exps, axis=1, keepdims=True)         # (TB, 1)
        log_denom = jnp.log(denom)

        # fine CE: nll = log(sum exp(logits)) - logits[label]
        label_logit = jnp.sum(jnp.where(class_ids == labels, logits, 0.0),
                              axis=1, keepdims=True)
        nll = log_denom + row_max - label_logit

        # coarse BCE: direct inlier & outlier exp-sums (no cancellation).
        zero_col = jnp.zeros((tb, 1), jnp.float32)
        if num_inlier % 128 == 0:
            in_sum = (jnp.sum(exps[:, :num_inlier], axis=1, keepdims=True)
                      if num_inlier > 0 else zero_col)
            out_sum = (jnp.sum(exps[:, num_inlier:], axis=1, keepdims=True)
                       if num_inlier < c else zero_col)
        else:
            # aligned slices + one masked 128-wide boundary block
            lo = (num_inlier // 128) * 128
            hi = min(lo + 128, c)
            bnd = exps[:, lo:hi]
            bnd_ids = lo + jax.lax.broadcasted_iota(jnp.int32, (tb, hi - lo), 1)
            in_sum = jnp.sum(jnp.where(bnd_ids < num_inlier, bnd, 0.0),
                             axis=1, keepdims=True)
            out_sum = jnp.sum(jnp.where(bnd_ids >= num_inlier, bnd, 0.0),
                              axis=1, keepdims=True)
            if lo > 0:
                in_sum = in_sum + jnp.sum(exps[:, :lo], axis=1, keepdims=True)
            if hi < c:
                out_sum = out_sum + jnp.sum(exps[:, hi:], axis=1, keepdims=True)

        log_p = jnp.maximum(jnp.log(out_sum) - log_denom, -100.0)
        log_1mp = jnp.maximum(jnp.log(in_sum) - log_denom, -100.0)
        y = (labels >= num_inlier).astype(jnp.float32)
        bce = -(y * log_p + (1.0 - y) * log_1mp)

        # mask padded / clamped-duplicate rows with a select (never multiply)
        row_loss = nll + lambda_coarse * bce                  # (TB, 1)
        row0 = (core * tiles_per_core + step) * block_rows
        row_ids = row0 + jax.lax.broadcasted_iota(jnp.int32, (tb, 1), 0)
        row_loss = jnp.where(row_ids < batch, row_loss, 0.0)

        acc_ref[...] += jnp.sum(row_loss)

        @pl.when(step == tiles_per_core - 1)
        def _finalize():
            out_ref[...] = jnp.full(out_ref.shape,
                                    jnp.sum(acc_ref[...]) * inv_b, jnp.float32)

    return kernel


def _make_col_major_kernel(batch, num_inlier, lambda_coarse,
                           tiles_per_core, block_cols):
    """Layout (classes, rows): used when C < 128.  Batch maps to lanes, class
    reductions are cheap sublane reductions, accumulation is lane-dense."""
    inv_b = 1.0 / float(batch)

    def kernel(logits_ref, labels_ref, out_ref, acc_ref):
        core = pl.program_id(0)
        step = pl.program_id(1)

        @pl.when(step == 0)
        def _init():
            acc_ref[...] = jnp.zeros_like(acc_ref)

        logits = logits_ref[...].astype(jnp.float32)        # (C, TB)
        labels = labels_ref[...]                            # (1, TB) int32
        c, tb = logits.shape

        class_ids = jax.lax.broadcasted_iota(jnp.int32, (c, tb), 0)

        col_max = jnp.max(logits, axis=0, keepdims=True)     # (1, TB)
        exps = jnp.exp(logits - col_max)                     # (C, TB)
        denom = jnp.sum(exps, axis=0, keepdims=True)
        log_denom = jnp.log(denom)

        label_logit = jnp.sum(jnp.where(class_ids == labels, logits, 0.0),
                              axis=0, keepdims=True)
        nll = log_denom + col_max - label_logit

        is_outlier = class_ids >= num_inlier
        out_sum = jnp.sum(jnp.where(is_outlier, exps, 0.0),
                          axis=0, keepdims=True)
        in_sum = jnp.sum(jnp.where(is_outlier, 0.0, exps),
                         axis=0, keepdims=True)

        log_p = jnp.maximum(jnp.log(out_sum) - log_denom, -100.0)
        log_1mp = jnp.maximum(jnp.log(in_sum) - log_denom, -100.0)
        y = (labels >= num_inlier).astype(jnp.float32)
        bce = -(y * log_p + (1.0 - y) * log_1mp)

        per_row = nll + lambda_coarse * bce                   # (1, TB)
        col0 = (core * tiles_per_core + step) * block_cols
        col_ids = col0 + jax.lax.broadcasted_iota(jnp.int32, (1, tb), 1)
        per_row = jnp.where(col_ids < batch, per_row, 0.0)

        acc_ref[...] += per_row        # lane-dense add; reduce only at the end

        @pl.when(step == tiles_per_core - 1)
        def _finalize():
            out_ref[...] = jnp.full(out_ref.shape,
                                    jnp.sum(acc_ref[...]) * inv_b, jnp.float32)

    return kernel


def hod_loss(logits, labels, *, num_inlier_classes, num_outlier_classes,
             lambda_coarse=0.1, block_rows=None, num_cores=None):
    """Pallas implementation of HODLoss.forward.

    logits: (B, num_inlier + num_outlier), any float dtype (cast in-kernel)
    labels: (B,) integer class indices
    returns: scalar float32 loss
    """
    # TODO(synk): F.cross_entropy's ignore_index (-100) path is not handled;
    # labels are assumed to be valid class indices, as in the reference module.
    b, c = logits.shape
    assert c == num_inlier_classes + num_outlier_classes
    labels_i32 = labels.astype(jnp.int32)

    itemsize = jnp.dtype(logits.dtype).itemsize
    vmem_cap = _vmem_capacity_bytes()

    # Small class counts -> batch on lanes (transposed layout); for C >= 128
    # the natural (rows, classes) layout already fills the lanes.
    use_transposed = c < 128
    align = 128 if use_transposed else 8

    if block_rows is None:
        tb = _choose_block_rows(b, c, itemsize, vmem_cap, align)
    else:
        tb = max(align, (int(block_rows) // align) * align)
    if tb >= b:
        tb = b
    num_tiles = pl.cdiv(b, tb)

    if num_cores is None:
        num_cores = 2 if num_tiles >= 2 else 1   # use both v7x TensorCores
    num_cores = max(1, min(int(num_cores), num_tiles))
    tiles_per_core = pl.cdiv(num_tiles, num_cores)
    last_tile = num_tiles - 1

    def tile_idx(core, step):
        # Clamp so a ragged last core never DMAs out of range; the kernel
        # masks duplicated rows by their logical row index.
        return jnp.minimum(core * tiles_per_core + step, last_tile)

    if use_transposed:
        # TODO(synk): ideally the producer would emit (C, B) directly; this
        # transpose costs one extra pass over logits in HBM.
        logits_in = jnp.transpose(logits)                     # (C, B)
        labels_in = labels_i32.reshape(1, b)
        in_specs = [
            pl.BlockSpec((c, tb), lambda core, step: (0, tile_idx(core, step))),
            pl.BlockSpec((1, tb), lambda core, step: (0, tile_idx(core, step))),
        ]
        acc_shape = (1, tb)
        kernel = _make_col_major_kernel(b, int(num_inlier_classes),
                                        float(lambda_coarse),
                                        tiles_per_core, tb)
    else:
        logits_in = logits                                    # (B, C), native dtype
        labels_in = labels_i32.reshape(b, 1)
        in_specs = [
            pl.BlockSpec((tb, c), lambda core, step: (tile_idx(core, step), 0)),
            pl.BlockSpec((tb, 1), lambda core, step: (tile_idx(core, step), 0)),
        ]
        acc_shape = (1, 1)
        kernel = _make_row_major_kernel(b, int(num_inlier_classes),
                                        float(lambda_coarse),
                                        tiles_per_core, tb)

    # Scoped-VMEM limit sized to the real footprint (double-buffered tile +
    # live f32 intermediates), capped well under per-core physical VMEM.
    tile_bytes = 2 * tb * c * itemsize + 5 * tb * c * 4 + 8 * tb * 4
    vmem_limit = int(min(vmem_cap * 3 // 4, max(32 * _MIB, 2 * tile_bytes)))

    partials = pl.pallas_call(
        kernel,
        out_shape=jax.ShapeDtypeStruct((num_cores, 8, 128), jnp.float32),
        grid=(num_cores, tiles_per_core),
        in_specs=in_specs,
        out_specs=pl.BlockSpec((1, 8, 128), lambda core, step: (core, 0, 0)),
        scratch_shapes=[pltpu.VMEM(acc_shape, jnp.float32)],
        compiler_params=pltpu.CompilerParams(
            dimension_semantics=("parallel", "arbitrary"),
            vmem_limit_bytes=vmem_limit),
    )(logits_in, labels_in)

    # Each core's block is filled with its (already 1/B-scaled) partial sum.
    return jnp.sum(partials[:, 0, 0])


def _reference_hod_loss(logits, labels, num_inlier_classes, lambda_coarse):
    logits = logits.astype(jnp.float32)
    logp = jax.nn.log_softmax(logits, axis=1)
    fine = -jnp.mean(jnp.take_along_axis(logp, labels[:, None], axis=1))
    probs = jax.nn.softmax(logits, axis=1)
    p_out = jnp.sum(probs[:, num_inlier_classes:], axis=1)
    y = (labels >= num_inlier_classes).astype(jnp.float32)
    log_p = jnp.maximum(jnp.log(p_out), -100.0)
    log_1mp = jnp.maximum(jnp.log(1.0 - p_out), -100.0)
    coarse = jnp.mean(-(y * log_p + (1.0 - y) * log_1mp))
    return fine + lambda_coarse * coarse


def _check(name, loss, ref, rtol=1e-4, atol=1e-4):
    if not bool(jnp.allclose(loss, ref, rtol=rtol, atol=atol)):
        raise AssertionError(f"{name}: kernel={float(loss)} ref={float(ref)}")


if __name__ == "__main__":
    key = jax.random.PRNGKey(0)
    keys = jax.random.split(key, 8)

    # case 1: small C (transposed, lane-dense path), single tile, 1 core
    n_in, n_out = 5, 3
    B, C = 8, n_in + n_out
    logits = jax.random.normal(keys[0], (B, C), dtype=jnp.float32)
    labels = jax.random.randint(keys[1], (B,), 0, C, dtype=jnp.int32)
    loss = jax.block_until_ready(
        hod_loss(logits, labels, num_inlier_classes=n_in,
                 num_outlier_classes=n_out, lambda_coarse=0.1))
    _check("case1", loss, _reference_hod_loss(logits, labels, n_in, 0.1))

    # case 2: small C, tiled batch with ragged last tile + clamped duplicate
    # tile on core 1 (exercises masking + 2-core split)
    B = 300
    logits = jax.random.normal(keys[2], (B, C), dtype=jnp.float32)
    labels = jax.random.randint(keys[3], (B,), 0, C, dtype=jnp.int32)
    loss = jax.block_until_ready(
        hod_loss(logits, labels, num_inlier_classes=n_in,
                 num_outlier_classes=n_out, lambda_coarse=0.1,
                 block_rows=128))
    _check("case2", loss, _reference_hod_loss(logits, labels, n_in, 0.1))

    # case 3: large C (row-major path), bf16 input, unaligned inlier/outlier
    # split (boundary-block path), tiled + 2-core + clamped duplicate tile
    n_in, n_out = 200, 56
    B, C = 200, n_in + n_out
    logits = jax.random.normal(keys[4], (B, C),
                               dtype=jnp.float32).astype(jnp.bfloat16)
    labels = jax.random.randint(keys[5], (B,), 0, C, dtype=jnp.int32)
    loss = jax.block_until_ready(
        hod_loss(logits, labels, num_inlier_classes=n_in,
                 num_outlier_classes=n_out, lambda_coarse=0.1,
                 block_rows=48))
    _check("case3", loss, _reference_hod_loss(logits, labels, n_in, 0.1))

    # case 4: large C, 128-aligned split (pure lane-slice path), single tile
    n_in, n_out = 128, 64
    B, C = 32, n_in + n_out
    logits = jax.random.normal(keys[6], (B, C), dtype=jnp.float32)
    labels = jax.random.randint(keys[7], (B,), 0, C, dtype=jnp.int32)
    loss = jax.block_until_ready(
        hod_loss(logits, labels, num_inlier_classes=n_in,
                 num_outlier_classes=n_out, lambda_coarse=0.1))
    _check("case4", loss, _reference_hod_loss(logits, labels, n_in, 0.1))

    print("KERNEL_OK")
</pallas_src>

<mosaic_0001>
module attributes {stable_mosaic.version = 11 : i64} {
  func.func @kernel(%arg0: i32, %arg1: i32, %arg2: memref<8x8xf32, #tpu.memory_space<vmem>>, %arg3: memref<1x8xi32, #tpu.memory_space<vmem>>, %arg4: memref<1x8x128xf32, #tpu.memory_space<vmem>>, %arg5: memref<1x8xf32, #tpu.memory_space<vmem>>) attributes {dimension_semantics = [#tpu.dimension_semantics<parallel>, #tpu.dimension_semantics<arbitrary>], iteration_bounds = array<i64: 1, 1>, scalar_prefetch = 0 : i64, scratch_operands = 1 : i64, tpu.core_type = #tpu.core_type<tc>, window_params = [{transform_indices = @transform_0, window_bounds = array<i64: 8, 8>}, {transform_indices = @transform_1, window_bounds = array<i64: 1, 8>}, {transform_indices = @transform_2, window_bounds = array<i64: 1, 8, 128>}]} {
    %c0_i32 = arith.constant 0 : i32
    %0 = arith.cmpi eq, %arg1, %c0_i32 : i32
    %1 = arith.extui %0 : i1 to i32
    %c0_i32_0 = arith.constant 0 : i32
    %2 = arith.cmpi ne, %1, %c0_i32_0 : i32
    scf.if %2 {
      %cst_25 = arith.constant 0.000000e+00 : f32
      %70 = vector.broadcast %cst_25 : f32 to vector<1x8xf32>
      %c0_26 = arith.constant 0 : index
      %c0_27 = arith.constant 0 : index
      %71 = vector.load %arg5[%c0_26, %c0_27] : memref<1x8xf32, #tpu.memory_space<vmem>>, vector<1x8xf32>
      tpu.vector_store %arg5[%c0_26, %c0_27], %70 {strides = array<i32>} : memref<1x8xf32, #tpu.memory_space<vmem>>, vector<1x8xf32>,
    } else {
    }
    %c0 = arith.constant 0 : index
    %c0_1 = arith.constant 0 : index
    %3 = vector.load %arg2[%c0, %c0_1] : memref<8x8xf32, #tpu.memory_space<vmem>>, vector<8x8xf32>
    %c0_2 = arith.constant 0 : index
    %c0_3 = arith.constant 0 : index
    %4 = vector.load %arg3[%c0_2, %c0_3] : memref<1x8xi32, #tpu.memory_space<vmem>>, vector<1x8xi32>
    %5 = tpu.iota {dimensions = array<i32: 0>} : vector<8x8xi32>
    %cst = arith.constant dense<0xFF800000> : vector<8xf32>
    %6 = vector.multi_reduction <maximumf>, %3, %cst [0] : vector<8x8xf32> to vector<8xf32>
    %7 = vector.shape_cast %6 : vector<8xf32> to vector<1x8xf32>
    %8 = vector.broadcast %7 : vector<1x8xf32> to vector<8x8xf32>
    %9 = arith.subf %3, %8 : vector<8x8xf32>
    %10 = math.exp %9 : vector<8x8xf32>
    %cst_4 = arith.constant dense<0.000000e+00> : vector<8xf32>
    %11 = vector.multi_reduction <add>, %10, %cst_4 [0] : vector<8x8xf32> to vector<8xf32>
    %12 = vector.shape_cast %11 : vector<8xf32> to vector<1x8xf32>
    %13 = math.log %12 : vector<1x8xf32>
    %14 = vector.broadcast %4 : vector<1x8xi32> to vector<8x8xi32>
    %15 = arith.cmpi eq, %5, %14 : vector<8x8xi32>
    %cst_5 = arith.constant 0.000000e+00 : f32
    %16 = vector.broadcast %cst_5 : f32 to vector<8x8xf32>
    %17 = arith.select %15, %3, %16 : vector<8x8xi1>, vector<8x8xf32>
    %cst_6 = arith.constant dense<0.000000e+00> : vector<8xf32>
    %18 = vector.multi_reduction <add>, %17, %cst_6 [0] : vector<8x8xf32> to vector<8xf32>
    %19 = vector.shape_cast %18 : vector<8xf32> to vector<1x8xf32>
    %20 = arith.addf %13, %7 : vector<1x8xf32>
    %21 = arith.subf %20, %19 : vector<1x8xf32>
    %c5_i32 = arith.constant 5 : i32
    %22 = vector.broadcast %c5_i32 : i32 to vector<8x8xi32>
    %23 = arith.cmpi sge, %5, %22 : vector<8x8xi32>
    %cst_7 = arith.constant 0.000000e+00 : f32
    %24 = vector.broadcast %cst_7 : f32 to vector<8x8xf32>
    %25 = arith.select %23, %10, %24 : vector<8x8xi1>, vector<8x8xf32>
    %cst_8 = arith.constant dense<0.000000e+00> : vector<8xf32>
    %26 = vector.multi_reduction <add>, %25, %cst_8 [0] : vector<8x8xf32> to vector<8xf32>
    %27 = vector.shape_cast %26 : vector<8xf32> to vector<1x8xf32>
    %cst_9 = arith.constant 0.000000e+00 : f32
    %28 = vector.broadcast %cst_9 : f32 to vector<8x8xf32>
    %29 = arith.select %23, %28, %10 : vector<8x8xi1>, vector<8x8xf32>
    %cst_10 = arith.constant dense<0.000000e+00> : vector<8xf32>
    %30 = vector.multi_reduction <add>, %29, %cst_10 [0] : vector<8x8xf32> to vector<8xf32>
    %31 = vector.shape_cast %30 : vector<8xf32> to vector<1x8xf32>
    %32 = math.log %27 : vector<1x8xf32>
    %33 = arith.subf %32, %13 : vector<1x8xf32>
    %cst_11 = arith.constant -1.000000e+02 : f32
    %34 = vector.broadcast %cst_11 : f32 to vector<1x8xf32>
    %35 = arith.maximumf %33, %34 : vector<1x8xf32>
    %36 = math.log %31 : vector<1x8xf32>
    %37 = arith.subf %36, %13 : vector<1x8xf32>
    %cst_12 = arith.constant -1.000000e+02 : f32
    %38 = vector.broadcast %cst_12 : f32 to vector<1x8xf32>
    %39 = arith.maximumf %37, %38 : vector<1x8xf32>
    %c5_i32_13 = arith.constant 5 : i32
    %40 = vector.broadcast %c5_i32_13 : i32 to vector<1x8xi32>
    %41 = arith.cmpi sge, %4, %40 : vector<1x8xi32>
    %42 = arith.extui %41 : vector<1x8xi1> to vector<1x8xi32>
    %43 = arith.sitofp %42 : vector<1x8xi32> to vector<1x8xf32>
    %44 = arith.mulf %43, %35 : vector<1x8xf32>
    %cst_14 = arith.constant 1.000000e+00 : f32
    %45 = vector.broadcast %cst_14 : f32 to vector<1x8xf32>
    %46 = arith.subf %45, %43 : vector<1x8xf32>
    %47 = arith.mulf %46, %39 : vector<1x8xf32>
    %48 = arith.addf %44, %47 : vector<1x8xf32>
    %cst_15 = arith.constant 0.000000e+00 : f32
    %49 = vector.broadcast %cst_15 : f32 to vector<1x8xf32>
    %50 = arith.subf %49, %48 : vector<1x8xf32>
    %cst_16 = arith.constant 1.000000e-01 : f32
    %51 = vector.broadcast %cst_16 : f32 to vector<1x8xf32>
    %52 = arith.mulf %51, %50 : vector<1x8xf32>
    %53 = arith.addf %21, %52 : vector<1x8xf32>
    %c1_i32 = arith.constant 1 : i32
    %54 = arith.muli %arg0, %c1_i32 : i32
    %55 = arith.addi %54, %arg1 : i32
    %c8_i32 = arith.constant 8 : i32
    %56 = arith.muli %55, %c8_i32 : i32
    %57 = tpu.iota {dimensions = array<i32: 1>} : vector<1x8xi32>
    %58 = vector.broadcast %56 : i32 to vector<1x8xi32>
    %59 = arith.addi %58, %57 : vector<1x8xi32>
    %c8_i32_17 = arith.constant 8 : i32
    %60 = vector.broadcast %c8_i32_17 : i32 to vector<1x8xi32>
    %61 = arith.cmpi slt, %59, %60 : vector<1x8xi32>
    %cst_18 = arith.constant 0.000000e+00 : f32
    %62 = vector.broadcast %cst_18 : f32 to vector<1x8xf32>
    %63 = arith.select %61, %53, %62 : vector<1x8xi1>, vector<1x8xf32>
    %c0_19 = arith.constant 0 : index
    %c0_20 = arith.constant 0 : index
    %64 = vector.load %arg5[%c0_19, %c0_20] : memref<1x8xf32, #tpu.memory_space<vmem>>, vector<1x8xf32>
    %65 = arith.addf %64, %63 : vector<1x8xf32>
    %c0_21 = arith.constant 0 : index
    %c0_22 = arith.constant 0 : index
    %66 = vector.load %arg5[%c0_21, %c0_22] : memref<1x8xf32, #tpu.memory_space<vmem>>, vector<1x8xf32>
    tpu.vector_store %arg5[%c0_21, %c0_22], %65 {strides = array<i32>} : memref<1x8xf32, #tpu.memory_space<vmem>>, vector<1x8xf32>,
    %c0_i32_23 = arith.constant 0 : i32
    %67 = arith.cmpi eq, %arg1, %c0_i32_23 : i32
    %68 = arith.extui %67 : i1 to i32
    %c0_i32_24 = arith.constant 0 : i32
    %69 = arith.cmpi ne, %68, %c0_i32_24 : i32
    scf.if %69 {
      %c0_25 = arith.constant 0 : index
      %c0_26 = arith.constant 0 : index
      %70 = vector.load %arg5[%c0_25, %c0_26] : memref<1x8xf32, #tpu.memory_space<vmem>>, vector<1x8xf32>
      %71 = vector.shape_cast %70 : vector<1x8xf32> to vector<1x1x8xf32>
      %cst_27 = arith.constant dense<0.000000e+00> : vector<1xf32>
      %72 = vector.multi_reduction <add>, %71, %cst_27 [1, 2] : vector<1x1x8xf32> to vector<1xf32>
      %73 = vector.shape_cast %72 : vector<1xf32> to vector<1x1x1xf32>
      %74 = vector.extract %73[0, 0, 0] : f32 from vector<1x1x1xf32>
      %cst_28 = arith.constant 1.250000e-01 : f32
      %75 = arith.mulf %74, %cst_28 : f32
      %76 = vector.broadcast %75 : f32 to vector<1x8x128xf32>
      %c0_29 = arith.constant 0 : index
      %c0_30 = arith.constant 0 : index
      %c0_31 = arith.constant 0 : index
      %77 = vector.load %arg4[%c0_29, %c0_30, %c0_31] : memref<1x8x128xf32, #tpu.memory_space<vmem>>, vector<1x8x128xf32>
      tpu.vector_store %arg4[%c0_29, %c0_30, %c0_31], %76 {strides = array<i32>} : memref<1x8x128xf32, #tpu.memory_space<vmem>>, vector<1x8x128xf32>,
    } else {
    }
    return
  }
  func.func @transform_0(%arg0: i32, %arg1: i32) -> (i32, i32) {
    %c1_i32 = arith.constant 1 : i32
    %0 = arith.muli %arg0, %c1_i32 : i32
    %1 = arith.addi %0, %arg1 : i32
    %c0_i32 = arith.constant 0 : i32
    %2 = arith.minsi %1, %c0_i32 : i32
    %c0_i32_0 = arith.constant 0 : i32
    %c0_i32_1 = arith.constant 0 : i32
    return %c0_i32_0, %2 : i32, i32
  }
  func.func @transform_1(%arg0: i32, %arg1: i32) -> (i32, i32) {
    %c1_i32 = arith.constant 1 : i32
    %0 = arith.muli %arg0, %c1_i32 : i32
    %1 = arith.addi %0, %arg1 : i32
    %c0_i32 = arith.constant 0 : i32
    %2 = arith.minsi %1, %c0_i32 : i32
    %c0_i32_0 = arith.constant 0 : i32
    %c0_i32_1 = arith.constant 0 : i32
    return %c0_i32_0, %2 : i32, i32
  }
  func.func @transform_2(%arg0: i32, %arg1: i32) -> (i32, i32, i32) {
    %c0_i32 = arith.constant 0 : i32
    %c0_i32_0 = arith.constant 0 : i32
    %c0_i32_1 = arith.constant 0 : i32
    return %arg0, %c0_i32, %c0_i32_0 : i32, i32, i32
  }
}

</mosaic_0001>

<bundles_post_ra>
// kernel: tpu_custom_call.1
= control target key start
LH: loop header
LB: loop body
LE: loop exit
PB: predicated region body
PF: predicated region fallthrough
CT: control target
= control target key end

     0   :  { %7 = vsyncpa [#allocation4], 0  ;;  %s278_s0 = inlined_call_operand.hbm [shape: f32[8,8], index: 0, kind: input, shape index: {}]   ;;  %s279_s1 = inlined_call_operand.vmem [shape: s32[1,8], index: 1, kind: input, shape index: {}]   ;;  %s280_s2 = inlined_call_operand.hbm [shape: f32[1,8,128], index: 2, kind: output, shape index: {}]  }
   0x1   :  { %8 = vsyncpa [#allocation5], 0  ;;  %s243_s9 = smov [#allocation3]  }
   0x2   :  { %s20_s10 = sshll.u32 %s243_s9, 4  ;;  %s21_s10 = int_to_ptr.vmem [resolvable:$true] %s20_s10 }
   0x3   :  { %s207_s11 = scalar_lea.vmem %s21_s10, 128  ;;  %p212_p1 = scmp.lt.s32.totalorder %s21_s10, %s21_s10 }
   0x4   :  { %p208_p0 = scmp.ne.s32.totalorder %s21_s10, %s207_s11  ;;  %p213_p2 = scmp.lt.s32.totalorder %s207_s11, %s207_s11 }
   0x6   :  { %p214_p3 = por %p213_p2, %p212_p1 }
   0x8   :  { %p215_p4 = pnand %p214_p3, %p208_p0 }
   0xa   :  { %218 = shalt.err (!%p215_p4)
}
   0xb   :  { %23 = dma.hbm_to_vmem [thread:$0]  %s278_s0, 128, %s21_s10, [#allocation4]  }
   0xc   :  { %239 = dma.done.wait [#allocation4], 128  }
   0xd   :  { %240 = vsyncadd [#allocation4], 4294967168  ;;  %vm60_vm0 = vcmask 57344   ;;  %v244_v0 = vmov 0.0   ;;  %vm66_vm1 = vcmask 64512   ;;  %v62_v1 = vld [vmem:[#allocation3] sm:$0xff]  ;;  %v64_v11 = vlaneseq }
   0xe   :  { %61 = vst.msk [vmem:[#allocation2] sm:$0x1] %vm60_vm0, %v244_v0  ;;  %v67_v2 = vsel %vm66_vm1, %v62_v1, -inf  ;;  %v63_v15 = vld [vmem:[%s279_s1] sm:$0x1]  ;;  %s245_s1 = smov [#allocation6]  }
   0xf   :  { %v68_v3 = vrot.slane %v67_v2, 4  ;;  %v65_v12 = vshrl.u32 %v64_v11, 7  ;;  %vm126_vm4 = vcmp.ge.s32.totalorder %v63_v15, 5  ;;  %s171_s15 = sshll.u32 %s245_s1, 4  ;;  %s172_s15 = int_to_ptr.vmem [resolvable:$true] %s171_s15 }
  0x10   :  { %v185_v51 = vsel %vm126_vm4, 1.0, %v244_v0  ;;  %s219_s18 = scalar_lea.vmem %s172_s15, 128  ;;  %p224_p6 = scmp.lt.s32.totalorder %s172_s15, %s172_s15 }
  0x11   :  { %v69_v4 = vmax.f32 %v67_v2, %v68_v3  ;;  %vm101_vm2 = vcmp.ge.s32.totalorder %v65_v12, 5  ;;  %v88_v13 = vsub.s32 0, %v65_v12  ;;  %v130_v56 = vsub.f32 1.0, %v185_v51  ;;  %p220_p5 = scmp.ne.s32.totalorder %s172_s15, %s219_s18  ;;  %p225_p7 = scmp.lt.s32.totalorder %s219_s18, %s219_s18 }
  0x13   :  { %v70_v5 = vrot.slane %v69_v4, 2  ;;  %v89_v22 = vrot.slane %v63_v15, %v88_v13  ;;  %p226_p8 = por %p225_p7, %p224_p6 }
  0x15   :  { %v71_v6 = vmax.f32 %v69_v4, %v70_v5  ;;  %vm90_vm3 = vcmp.eq.s32.totalorder %v65_v12, %v89_v22  ;;  %p227_p9 = pnand %p226_p8, %p220_p5 }
  0x16   :  { %v91_v35 = vsel %vm90_vm3, %v62_v1, 0.0 }
  0x17   :  { %v72_v7 = vrot.slane %v71_v6, 1  ;;  %v92_v39 = vsel %vm66_vm1, %v91_v35, 0.0 }
  0x18   :  { %v93_v42 = vrot.slane %v92_v39, 4 }
  0x19   :  { %v73_v8 = vmax.f32 %v71_v6, %v72_v7  ;;  %v144_v6 = vld [vmem:[#allocation2] sm:$0x1] }
  0x1a   :  { %v94_v43 = vadd.f32 %v93_v42, %v92_v39 }
  0x1b   :  { %v74_v9 = vsub.f32 %v62_v1, %v73_v8  ;;  %v139_v1 = vand.u32 127, %v64_v11 }
  0x1c   :  { %v95_v44 = vrot.slane %v94_v43, 2 }
  0x1d   :  { %v75_v10 = vmul.f32 1.442695, %v74_v9  ;;  %vm142_vm5 = vcmp.lt.s32.totalorder %v139_v1, 8 }
  0x1e   :  { %v96_v48 = vadd.f32 %v95_v44, %v94_v43 }
  0x1f   :  { %191 = vpow2.f32 %v75_v10 }
  0x20   :  { %v97_v54 = vrot.slane %v96_v48, 1 }
  0x22   :  { %v98_v60 = vadd.f32 %v97_v54, %v96_v48 }
  0x2c   :  { %v192_v14 = vpop.eup %191 }
  0x2d   :  { %v77_v16 = vsel %vm66_vm1, %v192_v14, 0.0  ;;  %v102_v17 = vsel %vm101_vm2, %v192_v14, 0.0  ;;  %v110_v18 = vsel %vm101_vm2, 0.0, %v192_v14 }
  0x2e   :  { %v78_v19 = vrot.slane %v77_v16, 4  ;;  %v103_v20 = vsel %vm66_vm1, %v102_v17, 0.0  ;;  %v111_v21 = vsel %vm66_vm1, %v110_v18, 0.0 }
  0x2f   :  { %v104_v23 = vrot.slane %v103_v20, 4  ;;  %v112_v24 = vrot.slane %v111_v21, 4 }
  0x30   :  { %v79_v25 = vadd.f32 %v78_v19, %v77_v16 }
  0x31   :  { %v105_v26 = vadd.f32 %v104_v23, %v103_v20  ;;  %v113_v27 = vadd.f32 %v112_v24, %v111_v21 }
  0x32   :  { %v80_v28 = vrot.slane %v79_v25, 2 }
  0x33   :  { %v106_v29 = vrot.slane %v105_v26, 2  ;;  %v114_v30 = vrot.slane %v113_v27, 2 }
  0x34   :  { %v81_v31 = vadd.f32 %v80_v28, %v79_v25 }
  0x35   :  { %v107_v32 = vadd.f32 %v106_v29, %v105_v26  ;;  %v115_v33 = vadd.f32 %v114_v30, %v113_v27 }
  0x36   :  { %v82_v34 = vrot.slane %v81_v31, 1 }
  0x37   :  { %v108_v36 = vrot.slane %v107_v32, 1  ;;  %v116_v37 = vrot.slane %v115_v33, 1 }
  0x38   :  { %v83_v38 = vadd.f32 %v82_v34, %v81_v31 }
  0x39   :  { %v109_v40 = vadd.f32 %v108_v36, %v107_v32  ;;  %v117_v41 = vadd.f32 %v116_v37, %v115_v33 }
  0x3a   :  { %193 = vlog2.f32 %v83_v38 }
  0x3b   :  { %195 = vlog2.f32 %v109_v40 }
  0x3c   :  { %197 = vlog2.f32 %v117_v41 }
  0x47   :  { %v194_v45 = vpop.eup %193 }
  0x48   :  { %v196_v46 = vpop.eup %195  ;;  %v85_v47 = vmul.f32 0.6931472, %v194_v45 }
  0x49   :  { %v198_v49 = vpop.eup %197  ;;  %v119_v50 = vmul.f32 0.6931472, %v196_v46 }
  0x4a   :  { %v123_v52 = vmul.f32 0.6931472, %v198_v49  ;;  %v99_v61 = vadd.f32 %v85_v47, %v73_v8 }
  0x4b   :  { %v120_v53 = vsub.f32 %v119_v50, %v85_v47 }
  0x4c   :  { %v124_v55 = vsub.f32 %v123_v52, %v85_v47  ;;  %v100_v2 = vsub.f32 %v99_v61, %v98_v60 }
  0x4d   :  { %v121_v57 = vmax.f32 %v120_v53, -100.0 }
  0x4e   :  { %v125_v58 = vmax.f32 %v124_v55, -100.0 }
  0x4f   :  { %v129_v59 = vmul.f32 %v185_v51, %v121_v57 }
  0x50   :  { %v131_v62 = vmul.f32 %v130_v56, %v125_v58 }
  0x52   :  { %v132_v63 = vadd.f32 %v131_v62, %v129_v59 }
  0x54   :  { %v133_v3 = vsub.f32 0.0, %v132_v63 }
  0x56   :  { %v134_v4 = vmul.f32 0.1, %v133_v3 }
  0x58   :  { %v135_v5 = vadd.f32 %v134_v4, %v100_v2 }
  0x5a   :  { %v143_v0 = vsel %vm142_vm5, %v135_v5, 0.0 }
  0x5b   :  { %v145_v7 = vadd.f32 %v144_v6, %v143_v0 }
  0x5d   :  { %147 = vst.msk [vmem:[#allocation2] sm:$0x1] %vm60_vm0, %v145_v7 }
  0x64   :  { %v151_v9 = vld [vmem:[#allocation2] sm:$0x1] }
  0x65   :  { %v152_v10 = vsel %vm60_vm0, %v151_v9, 0.0 }
  0x66   :  { %153 = vadd.xlane.f32.xlu0 %v152_v10 }
  0xef   :  { %v154_v12 = vpop.xlane.xlu0 %153 }
  0xf0   :  { %v155_v13 = vrot.slane %v154_v12, 4 }
  0xf2   :  { %v156_v8 = vadd.f32 %v155_v13, %v154_v12 }
  0xf4   :  { %v157_v14 = vrot.slane %v156_v8, 2 }
  0xf6   :  { %v158_v15 = vadd.f32 %v157_v14, %v156_v8 }
  0xf8   :  { %v159_v11 = vrot.slane %v158_v15, 1 }
  0xfa   :  { %v160_v16 = vadd.f32 %v159_v11, %v158_v15 }
  0xfc   :  { %186 = vpush %v160_v16 }
 0x12d   :  { %s187_s16 = spop %186 }
 0x12e   :  { %s162_s17 = smul.f32 0.125, %s187_s16 }
 0x130   :  { %v163_v17 = vstv %s162_s17 }
 0x131   :  { %164 = vst [vmem:[#allocation6] sm:$0xff] %v163_v17 }
 0x132   :  { %230 = shalt.err (!%p227_p9)
}
 0x133   :  { %174 = dma.vmem_to_hbm [thread:$0]  %s172_s15, 128, %s280_s2, [#allocation5]  }
 0x134   :  { %241 = dma.done.wait [#allocation5], 128  }
 0x135   :  { %242 = vsyncadd [#allocation5], 4294967168 }
 0x136   :  { %178 = vsyncpa [#allocation4], 1 }
 0x137   :  { %179 = vsyncpa [#allocation5], 1 }

</bundles_post_ra>
